<compile_context>
chip_gen: v5e
topology: v5e:2x2
jax: 0.10.0
libtpu: 0.0.40
codegen_flags: <defaults>
</compile_context>

<pallas_src>
import functools

import jax
import jax.numpy as jnp
import numpy as np
from jax.experimental import pallas as pl
from jax.experimental.pallas import tpu as pltpu


# ---------------------------------------------------------------------------
# Routing / tuning knobs.
# ---------------------------------------------------------------------------
_SMALL_MAX_VMEM_BYTES = 2 * 1024 * 1024   # below this padded footprint: VMEM gather
_TARGET_INFLIGHT_BYTES = 4 * 1024 * 1024  # ~HBM BW x DMA latency on v7x (covers v5e/v6e)
_MIN_INFLIGHT = 8
_MAX_INFLIGHT = 32


def _next_pow2(n: int) -> int:
    return 1 << max(0, int(n - 1).bit_length())


def _num_tensorcores() -> int:
    """2 only on v7x (2 TensorCores share HBM); 1 elsewhere. Best-effort."""
    try:
        kind = jax.devices()[0].device_kind.lower()
    except Exception:
        return 1
    return 2 if "v7" in kind else 1


def _padded_vmem_bytes(shape, itemsize: int) -> int:
    """Whole-array VMEM footprint under (8, 128) tiling of the last two dims."""
    s = tuple(shape) if len(shape) >= 2 else (shape[0], 1)
    lead = int(np.prod(s[:-2])) if len(s) > 2 else 1
    sub = -(-s[-2] // 8) * 8
    lane = -(-s[-1] // 128) * 128
    return int(lead * sub * lane * itemsize)


# ---------------------------------------------------------------------------
# Kernel 1: small-slab path — whole array in VMEM, row gather via dyn. slices.
# ---------------------------------------------------------------------------
def _vmem_gather_kernel(perm_ref, x_ref, o_ref, *, batch: int):
    """o[i] = x[perm[i]] with x, o fully resident in VMEM."""
    rest = tuple(slice(None) for _ in x_ref.shape[1:])

    def copy_row(i):
        src = perm_ref[i]
        o_ref[(pl.ds(i, 1),) + rest] = x_ref[(pl.ds(src, 1),) + rest]

    if batch <= 16:
        # Fully unrolled: gives the LLO scheduler visibility over all rows.
        for i in range(batch):
            copy_row(i)
    else:
        @pl.loop(0, batch)
        def _(i):
            copy_row(i)


# ---------------------------------------------------------------------------
# Kernel 2: large-slab path — direct HBM->HBM DMA gather.
# ---------------------------------------------------------------------------
def _dma_gather_kernel(perm_ref, x_hbm, o_hbm, sems, *,
                       batch: int, rows_per_core: int, num_inflight: int):
    """o_hbm[row] = x_hbm[perm[row]] via per-row HBM->HBM DMAs.

    Each grid step (one per TensorCore) handles rows
    [core * rows_per_core, (core + 1) * rows_per_core) with `num_inflight`
    copies in flight on its own DMA-semaphore slots.
    """
    K = num_inflight
    core = pl.program_id(0)
    row0 = core * rows_per_core

    # Prime up to K copies for this core.
    @pl.loop(0, min(K, rows_per_core))
    def _prime(i):
        row = row0 + i

        @pl.when(row < batch)
        def _():
            pltpu.make_async_copy(
                x_hbm.at[perm_ref[row]], o_hbm.at[row], sems.at[i & (K - 1)]
            ).start()

    # Steady state: wait row i, immediately refill its slot with row i + K.
    @pl.loop(0, rows_per_core)
    def _steady(i):
        row = row0 + i
        slot = i & (K - 1)
        nxt_row = row + K
        # Hoist the SMEM perm read above the semaphore wait (.wait() breaks
        # sst->sld forwarding); clamp so the read is always in bounds.
        nxt_src = perm_ref[jnp.minimum(nxt_row, batch - 1)]

        @pl.when(row < batch)
        def _wait():
            # Shape-only descriptor: any source row has the right byte count.
            pltpu.make_async_copy(x_hbm.at[0], o_hbm.at[row], sems.at[slot]).wait()

        @pl.when(jnp.logical_and(i + K < rows_per_core, nxt_row < batch))
        def _refill():
            pltpu.make_async_copy(
                x_hbm.at[nxt_src], o_hbm.at[nxt_row], sems.at[slot]
            ).start()


# ---------------------------------------------------------------------------
# Wrapper.
# ---------------------------------------------------------------------------
def batch_gather(x: jax.Array, perm: jax.Array) -> jax.Array:
    """Returns x[perm] along axis 0, computed by a Pallas TPU kernel."""
    if x.ndim == 1:
        return batch_gather(x[:, None], perm)[:, 0]

    B = x.shape[0]
    perm_i32 = perm.astype(jnp.int32)
    itemsize = x.dtype.itemsize
    bytes_moved = 2 * int(np.prod(x.shape)) * itemsize  # read + write

    # ---- Small-slab fast path: whole-array VMEM gather, single invocation. ----
    if _padded_vmem_bytes(x.shape, itemsize) <= _SMALL_MAX_VMEM_BYTES:
        zero_idx = (0,) * x.ndim
        return pl.pallas_call(
            functools.partial(_vmem_gather_kernel, batch=B),
            out_shape=jax.ShapeDtypeStruct(x.shape, x.dtype),
            grid_spec=pltpu.PrefetchScalarGridSpec(
                num_scalar_prefetch=1,                     # permutation -> SMEM
                grid=(1,),
                in_specs=[pl.BlockSpec(x.shape, lambda i, p: zero_idx)],
                out_specs=pl.BlockSpec(x.shape, lambda i, p: zero_idx),
            ),
            compiler_params=pltpu.CompilerParams(
                dimension_semantics=("arbitrary",)),
            cost_estimate=pl.CostEstimate(
                flops=0, transcendentals=0, bytes_accessed=bytes_moved),
        )(perm_i32, x)

    # ---- Large-slab path: HBM->HBM DMA gather on the ORIGINAL shape. ----
    # TODO(synk): huge-batch / tiny-row inputs (>2 MiB total, <~16 KiB rows)
    # remain descriptor-bound here; a batch-tiled VMEM gather would suit them.
    row_bytes = max(1, int(np.prod(x.shape[1:])) * itemsize)
    K = max(_MIN_INFLIGHT,
            min(_MAX_INFLIGHT,
                _next_pow2(-(-_TARGET_INFLIGHT_BYTES // row_bytes))))

    num_cores = _num_tensorcores()                 # 2 only on v7x
    rows_per_core = pl.cdiv(B, num_cores)

    kernel = functools.partial(
        _dma_gather_kernel, batch=B, rows_per_core=rows_per_core, num_inflight=K)

    return pl.pallas_call(
        kernel,
        out_shape=jax.ShapeDtypeStruct(x.shape, x.dtype),
        grid_spec=pltpu.PrefetchScalarGridSpec(
            num_scalar_prefetch=1,                         # permutation -> SMEM
            grid=(num_cores,),
            in_specs=[pl.BlockSpec(memory_space=pl.ANY)],  # stay in HBM
            out_specs=pl.BlockSpec(memory_space=pl.ANY),   # stay in HBM
            scratch_shapes=[pltpu.SemaphoreType.DMA((K,))],
        ),
        compiler_params=pltpu.CompilerParams(
            dimension_semantics=(("parallel",) if num_cores > 1 else ("arbitrary",)),
        ),
        cost_estimate=pl.CostEstimate(
            flops=0, transcendentals=0, bytes_accessed=bytes_moved),
    )(perm_i32, x)


class VCAPermutation:
    """JAX/Pallas port of the PyTorch VCAPermutation module."""

    def __init__(self, permutation_mode: str):
        self.permutation_mode = permutation_mode

    def __call__(self, frames: jax.Array, context: jax.Array, *, key):
        batch_size = frames.shape[0]
        assert context.shape[0] == batch_size
        # TODO(synk): torch.randperm uses PyTorch's global RNG stream; here the
        # permutation comes from an explicit JAX key (same distribution).
        permutation = jax.random.permutation(key, batch_size)
        if self.permutation_mode == "frames":
            return batch_gather(frames, permutation), context
        elif self.permutation_mode == "context":
            return frames, batch_gather(context, permutation)
        else:
            return frames, context


if __name__ == "__main__":
    key = jax.random.PRNGKey(0)
    k_frames, k_context, k_perm, k_big = jax.random.split(key, 4)

    # Small shapes: frames [B, C, H, W] (NCHW), context [B, D].
    B, C, H, W, D = 2, 4, 16, 16, 32
    frames = jax.random.normal(k_frames, (B, C, H, W), dtype=jnp.float32)
    context = jax.random.normal(k_context, (B, D), dtype=jnp.float32)

    perm = jax.random.permutation(k_perm, B)
    for mode in ("frames", "context", "none"):
        mod = VCAPermutation(mode)
        out_frames, out_context = mod(frames, context, key=k_perm)
        out_frames = jax.block_until_ready(out_frames)
        out_context = jax.block_until_ready(out_context)

        if mode == "frames":
            ref_frames, ref_context = frames[perm], context
        elif mode == "context":
            ref_frames, ref_context = frames, context[perm]
        else:
            ref_frames, ref_context = frames, context

        np.testing.assert_allclose(np.asarray(out_frames), np.asarray(ref_frames))
        np.testing.assert_allclose(np.asarray(out_context), np.asarray(ref_context))

    # Larger slab: exercises the HBM->HBM DMA-gather path (>2 MiB footprint).
    Bb = 16
    big = jax.random.normal(k_big, (Bb, 512, 128), dtype=jnp.float32)  # 4 MiB
    perm_big = jax.random.permutation(k_perm, Bb)
    out_big = jax.block_until_ready(batch_gather(big, perm_big))
    np.testing.assert_allclose(np.asarray(out_big), np.asarray(big[perm_big]))

    print("KERNEL_OK")
</pallas_src>

<mosaic_0001>
module attributes {stable_mosaic.version = 11 : i64} {
  func.func @_vmem_gather_kernel(%arg0: i32, %arg1: memref<2xi32, #tpu.memory_space<smem>>, %arg2: memref<2x4x16x16xf32, #tpu.memory_space<vmem>>, %arg3: memref<2x4x16x16xf32, #tpu.memory_space<vmem>>) attributes {dimension_semantics = [#tpu.dimension_semantics<arbitrary>], iteration_bounds = array<i64: 1>, scalar_prefetch = 1 : i64, scratch_operands = 0 : i64, tpu.core_type = #tpu.core_type<tc>, window_params = [{pipeline_mode = #tpu.pipeline_mode<synchronous>, transform_indices = @transform_0, window_bounds = array<i64: 2, 4, 16, 16>}, {pipeline_mode = #tpu.pipeline_mode<synchronous>, transform_indices = @transform_1, window_bounds = array<i64: 2, 4, 16, 16>}]} {
    %c0 = arith.constant 0 : index
    %0 = memref.load %arg1[%c0] : memref<2xi32, #tpu.memory_space<smem>>
    %1 = arith.index_cast %0 : i32 to index
    %c0_0 = arith.constant 0 : index
    %c0_1 = arith.constant 0 : index
    %c0_2 = arith.constant 0 : index
    %2 = vector.load %arg2[%1, %c0_0, %c0_1, %c0_2] : memref<2x4x16x16xf32, #tpu.memory_space<vmem>>, vector<1x4x16x16xf32>
    %c0_3 = arith.constant 0 : index
    %c0_4 = arith.constant 0 : index
    %c0_5 = arith.constant 0 : index
    %c0_6 = arith.constant 0 : index
    %3 = vector.load %arg3[%c0_3, %c0_4, %c0_5, %c0_6] : memref<2x4x16x16xf32, #tpu.memory_space<vmem>>, vector<1x4x16x16xf32>
    tpu.vector_store %arg3[%c0_3, %c0_4, %c0_5, %c0_6], %2 {strides = array<i32>} : memref<2x4x16x16xf32, #tpu.memory_space<vmem>>, vector<1x4x16x16xf32>,
    %c1 = arith.constant 1 : index
    %4 = memref.load %arg1[%c1] : memref<2xi32, #tpu.memory_space<smem>>
    %5 = arith.index_cast %4 : i32 to index
    %c0_7 = arith.constant 0 : index
    %c0_8 = arith.constant 0 : index
    %c0_9 = arith.constant 0 : index
    %6 = vector.load %arg2[%5, %c0_7, %c0_8, %c0_9] : memref<2x4x16x16xf32, #tpu.memory_space<vmem>>, vector<1x4x16x16xf32>
    %c1_10 = arith.constant 1 : index
    %c0_11 = arith.constant 0 : index
    %c0_12 = arith.constant 0 : index
    %c0_13 = arith.constant 0 : index
    %7 = vector.load %arg3[%c1_10, %c0_11, %c0_12, %c0_13] : memref<2x4x16x16xf32, #tpu.memory_space<vmem>>, vector<1x4x16x16xf32>
    tpu.vector_store %arg3[%c1_10, %c0_11, %c0_12, %c0_13], %6 {strides = array<i32>} : memref<2x4x16x16xf32, #tpu.memory_space<vmem>>, vector<1x4x16x16xf32>,
    return
  }
  func.func @transform_0(%arg0: i32, %arg1: memref<2xi32, #tpu.memory_space<smem>>) -> (i32, i32, i32, i32) {
    %c0_i32 = arith.constant 0 : i32
    %c0_i32_0 = arith.constant 0 : i32
    %c0_i32_1 = arith.constant 0 : i32
    %c0_i32_2 = arith.constant 0 : i32
    %c0_i32_3 = arith.constant 0 : i32
    return %c0_i32, %c0_i32_0, %c0_i32_1, %c0_i32_2 : i32, i32, i32, i32
  }
  func.func @transform_1(%arg0: i32, %arg1: memref<2xi32, #tpu.memory_space<smem>>) -> (i32, i32, i32, i32) {
    %c0_i32 = arith.constant 0 : i32
    %c0_i32_0 = arith.constant 0 : i32
    %c0_i32_1 = arith.constant 0 : i32
    %c0_i32_2 = arith.constant 0 : i32
    %c0_i32_3 = arith.constant 0 : i32
    return %c0_i32, %c0_i32_0, %c0_i32_1, %c0_i32_2 : i32, i32, i32, i32
  }
}

</mosaic_0001>

<bundles_post_ra>
// kernel: tpu_custom_call.1
= control target key start
LH: loop header
LB: loop body
LE: loop exit
PB: predicated region body
PF: predicated region fallthrough
CT: control target
= control target key end

     0   :  { %s171_s12 = smov [#allocation3]   ;;  %s222_s0 = inlined_call_operand.hbm [shape: s32[2], index: 0, kind: input, shape index: {}]   ;;  %s223_s1 = inlined_call_operand.hbm [shape: f32[2,4,16,16], index: 1, kind: input, shape index: {}]   ;;  %s224_s2 = inlined_call_operand.hbm [shape: f32[2,4,16,16], index: 2, kind: output, shape index: {}]  }
   0x1   :  { %s8_s11 = sshll.u32 %s222_s0, 4  ;;  %s9_s11 = int_to_ptr.hbm [resolvable:$true] %s8_s11 }
   0x2   :  { %11 = dma.hbm_to_smem %s9_s11, 16, %s171_s12, [#allocation2] }
   0x3   :  { %165 = dma.done.wait [#allocation2], 16 }
   0x4   :  { %166 = vsyncadd [#allocation2], 4294967280 }
   0x5   :  { %14 = sfence }
   0x6   :  { %15 = vsyncpa [#allocation5], 0 }
   0x7   :  { %16 = vsyncpa [#allocation6], 0  ;;  %s21_s15 = sshll.u32 %s223_s1, 4  ;;  %s172_s16 = smov [#allocation4]   ;;  %s22_s15 = int_to_ptr.hbm [resolvable:$true] %s21_s15 }
   0x8   :  { %s23_s17 = sshll.u32 %s172_s16, 4  ;;  %s173_s18 = smov 128   ;;  %s24_s17 = int_to_ptr.vmem [resolvable:$true] %s23_s17 }
   0x9   :  { %s174_s19 = smov 8  }
   0xa   :  { %29 = dma.hbm_to_vmem [thread:$0]  %s22_s15, 2048, %s24_s17, [#allocation5], %s173_s18, %s173_s18, %s174_s19  }
   0xb   :  { %167 = dma.done.wait [#allocation5], 2048  }
   0xc   :  { %168 = vsyncadd [#allocation5], 4294965248  ;;  %s34_s0 = sld [smem:[#allocation3]]  ;;  %vm45_vm0 = vcmask 130048   ;;  %s175_s24 = smov [#allocation7]  }
   0xd   :  { %s98_s20 = sld [smem:[#allocation3 + $0x1]]  ;;  %s78_s25 = sshll.u32 %s175_s24, 4  ;;  %s79_s25 = int_to_ptr.vmem [resolvable:$true] %s78_s25 }
   0xe   :  { %s80_s28 = sshll.u32 %s224_s2, 4  ;;  %s81_s28 = int_to_ptr.hbm [resolvable:$true] %s80_s28 }
  0x12   :  { %s97_s21 = sshll.u32 %s34_s0, 6 }
  0x13   :  { %s36_s22 = scalar_lea.vmem [#allocation4], %s97_s21  ;;  %s99_s1 = sshll.u32 %s98_s20, 6 }
  0x14   :  { %v37_v0 = vld [vmem:[%s36_s22] sm:$0xff]  ;;  %v38_v1 = vld [vmem:[%s36_s22 + $0x8] sm:$0xff]  ;;  %v39_v2 = vld [vmem:[%s36_s22 + $0x10] sm:$0xff]  ;;  %s56_s23 = scalar_lea.vmem [#allocation4], %s99_s1 }
  0x15   :  { %46 = vst.msk [vmem:[#allocation7] sm:$0xff] %vm45_vm0, %v37_v0  ;;  %v40_v3 = vld [vmem:[%s36_s22 + $0x18] sm:$0xff]  ;;  %v41_v4 = vld [vmem:[%s36_s22 + $0x20] sm:$0xff]  ;;  %v42_v5 = vld [vmem:[%s36_s22 + $0x28] sm:$0xff] }
  0x16   :  { %47 = vst.msk [vmem:[#allocation7 + $0x8] sm:$0xff] %vm45_vm0, %v38_v1  ;;  %v43_v6 = vld [vmem:[%s36_s22 + $0x30] sm:$0xff]  ;;  %v44_v7 = vld [vmem:[%s36_s22 + $0x38] sm:$0xff]  ;;  %v57_v8 = vld [vmem:[%s56_s23] sm:$0xff] }
  0x17   :  { %48 = vst.msk [vmem:[#allocation7 + $0x10] sm:$0xff] %vm45_vm0, %v39_v2  ;;  %v58_v9 = vld [vmem:[%s56_s23 + $0x8] sm:$0xff]  ;;  %v59_v10 = vld [vmem:[%s56_s23 + $0x10] sm:$0xff]  ;;  %v60_v11 = vld [vmem:[%s56_s23 + $0x18] sm:$0xff] }
  0x18   :  { %49 = vst.msk [vmem:[#allocation7 + $0x18] sm:$0xff] %vm45_vm0, %v40_v3  ;;  %v61_v12 = vld [vmem:[%s56_s23 + $0x20] sm:$0xff]  ;;  %v62_v13 = vld [vmem:[%s56_s23 + $0x28] sm:$0xff]  ;;  %v63_v14 = vld [vmem:[%s56_s23 + $0x30] sm:$0xff] }
  0x19   :  { %50 = vst.msk [vmem:[#allocation7 + $0x20] sm:$0xff] %vm45_vm0, %v41_v4  ;;  %v64_v15 = vld [vmem:[%s56_s23 + $0x38] sm:$0xff] }
  0x1a   :  { %51 = vst.msk [vmem:[#allocation7 + $0x28] sm:$0xff] %vm45_vm0, %v42_v5 }
  0x1b   :  { %52 = vst.msk [vmem:[#allocation7 + $0x30] sm:$0xff] %vm45_vm0, %v43_v6 }
  0x1c   :  { %53 = vst.msk [vmem:[#allocation7 + $0x38] sm:$0xff] %vm45_vm0, %v44_v7 }
  0x1d   :  { %66 = vst.msk [vmem:[#allocation7 + $0x40] sm:$0xff] %vm45_vm0, %v57_v8 }
  0x1e   :  { %67 = vst.msk [vmem:[#allocation7 + $0x48] sm:$0xff] %vm45_vm0, %v58_v9 }
  0x1f   :  { %68 = vst.msk [vmem:[#allocation7 + $0x50] sm:$0xff] %vm45_vm0, %v59_v10 }
  0x20   :  { %69 = vst.msk [vmem:[#allocation7 + $0x58] sm:$0xff] %vm45_vm0, %v60_v11 }
  0x21   :  { %70 = vst.msk [vmem:[#allocation7 + $0x60] sm:$0xff] %vm45_vm0, %v61_v12 }
  0x22   :  { %71 = vst.msk [vmem:[#allocation7 + $0x68] sm:$0xff] %vm45_vm0, %v62_v13 }
  0x23   :  { %72 = vst.msk [vmem:[#allocation7 + $0x70] sm:$0xff] %vm45_vm0, %v63_v14 }
  0x24   :  { %73 = vst.msk [vmem:[#allocation7 + $0x78] sm:$0xff] %vm45_vm0, %v64_v15 }
  0x25   :  { %86 = dma.vmem_to_hbm [thread:$0]  %s79_s25, 2048, %s81_s28, [#allocation6], %s173_s18, %s173_s18, %s174_s19  }
  0x26   :  { %169 = dma.done.wait [#allocation6], 2048  }
  0x27   :  { %170 = vsyncadd [#allocation6], 4294965248 }
  0x28   :  { %91 = vsyncpa [#allocation5], 1 }
  0x29   :  { %92 = vsyncpa [#allocation6], 1 }

</bundles_post_ra>
